<compile_context>
chip_gen: v5e
topology: v5e:2x2
jax: 0.10.0
libtpu: 0.0.40
codegen_flags: <defaults>
</compile_context>

<pallas_src>
import functools
import math

import jax
import jax.numpy as jnp
from jax.experimental import pallas as pl
from jax.experimental.pallas import tpu as pltpu

_SQRT_HALF = 0.7071067811865476


def _gelu_exact(v):
    # torch.nn.GELU() default = exact (erf based) gelu
    return 0.5 * v * (1.0 + jax.lax.erf(v * _SQRT_HALF))


def _sdg_kernel(x_ref, w1_ref, b1_ref, w2_ref, b2_ref, w3_ref, b3_ref,
                gate_ref, dist_ref,
                col_scr, row_scr, tap_scr,
                *, tau, lookback_range, num_gate_heads):
    f32 = jnp.float32
    L = gate_ref.shape[1]
    K = lookback_range
    H = num_gate_heads
    h_idx = pl.program_id(1)

    row = jax.lax.broadcasted_iota(jnp.int32, (L, L), 0)
    col = jax.lax.broadcasted_iota(jnp.int32, (L, L), 1)

    # ---- conv stack: computed once per batch element (first head step) -----
    @pl.when(h_idx == 0)
    def _():
        x = x_ref[0]                                                   # (L, E)
        h1 = _gelu_exact(
            jnp.dot(x, w1_ref[...], preferred_element_type=f32) + b1_ref[...])
        h2 = _gelu_exact(
            jnp.dot(h1, w2_ref[...], preferred_element_type=f32) + b2_ref[...])

        # Conv1d(E, H, K, padding=K) followed by [:, :, 1:-K]:
        #   dist[i, h] = tanh(b3[h] + sum_{k,e} W3[h,e,k] * h2[i + k - (K-1), e])
        # One (L, E) @ (E, K*H) matmul, then shift each tap along sublanes via
        # a zero-padded VMEM scratch (no (L, L) selection matmuls).
        proj = jnp.dot(h2, w3_ref[...], preferred_element_type=f32)   # (L, K*H)
        for k in range(K):
            tap_scr[k, K - 1:K - 1 + L, :] = proj[:, k * H:(k + 1) * H]
            if k < K - 1:
                tap_scr[k, 0:K - 1, :] = jnp.zeros((K - 1, H), f32)
        acc = tap_scr[K - 1, K - 1:K - 1 + L, :]        # tap k = K-1 (shift 0)
        for k in range(K - 1):
            acc = acc + tap_scr[k, k:k + L, :]          # tap k shifted by K-1-k
        dist = jnp.tanh(acc + b3_ref[...])                             # (L, H)

        # Per-head distance in both orientations + lane-dense head mean.
        # (eye-masked sublane reduce == transpose of one column; no MXU work)
        eye = (row == col).astype(f32)
        mean_row = jnp.zeros((1, L), f32)
        for hh in range(H):
            c = dist[:, hh:hh + 1]                                     # (L, 1)
            r = jnp.sum(c * eye, axis=0, keepdims=True)                # (1, L)
            col_scr[hh] = c
            row_scr[hh] = r
            mean_row = mean_row + r
        dist_ref[0] = mean_row * (1.0 / H)

    # ---- per-head gate: log-space cumulative products via tri matmuls ------
    d_col = col_scr[h_idx]                              # (L, 1)  d[i]
    d_row = row_scr[h_idx]                              # (1, L)  d[j]
    alpha = (jnp.clip((d_col - d_row) * tau, -1.0, 1.0) + 1.0) * 0.5   # (L, L)

    # cumprod == exp(triangular sum of logs); alpha == 0 maps to -1e30 so the
    # exp underflows to exactly 0 (no extra zero-count matmul needed).
    log_a = jnp.maximum(jnp.log(alpha), -1e30)
    logs_low = jnp.where(col < row, log_a, 0.0)         # strictly-lower logs
    logs_up = jnp.where(col > row, log_a, 0.0)          # strictly-upper logs

    t_suffix = (row >= col).astype(f32)                 # suffix-sum operator
    t_prefix = (row <= col).astype(f32)                 # prefix-sum operator
    lower = jnp.exp(jnp.dot(logs_low, t_suffix, preferred_element_type=f32))
    upper = jnp.exp(jnp.dot(logs_up, t_prefix, preferred_element_type=f32))
    gate_ref[0] = lower * upper


def syntactic_distance_gate(x, w1, b1, w2, b2, w3, b3, *,
                            num_gate_heads, lookback_range, tau):
    """x: (B, L, E);  conv weights in PyTorch shapes:
       w1, w2: (E, E, 1), b1, b2: (E,), w3: (H, E, K), b3: (H,).
       Returns (gate (B*H, L, L), distance (B, L, 1))   [mask_triu=False path]."""
    B, L, E = x.shape
    H, K = num_gate_heads, lookback_range
    f32 = jnp.float32

    w1t = jnp.transpose(w1[:, :, 0]).astype(f32)                 # (E_in, E_out)
    w2t = jnp.transpose(w2[:, :, 0]).astype(f32)                 # (E_in, E_out)
    # (H, E, K) -> (E, K, H) -> (E, K*H): column k*H + h holds W3[h, :, k]
    w3t = jnp.transpose(w3, (1, 2, 0)).reshape(E, K * H).astype(f32)
    b1r = b1.reshape(1, E).astype(f32)
    b2r = b2.reshape(1, E).astype(f32)
    b3r = b3.reshape(1, H).astype(f32)

    kernel = functools.partial(_sdg_kernel, tau=float(tau),
                               lookback_range=K, num_gate_heads=H)

    # Rough per-step VMEM footprint; raise the scoped limit when needed.
    lll = 4 * L * L
    est = (2 * lll                    # gate output block (double-buffered)
           + 10 * lll                 # live (L, L) f32 intermediates
           + 4 * 4 * L * E            # x block + h1/h2/proj
           + 4 * K * (L + K) * 128    # tap scratch (lane-padded)
           + 4 * H * L * 128          # column scratch (lane-padded)
           + 4 * H * 8 * L)           # row scratch
    vmem_limit = int(min(max(est, 32 * 1024 * 1024), 96 * 1024 * 1024))

    gate, dist = pl.pallas_call(
        kernel,
        out_shape=(jax.ShapeDtypeStruct((B * H, L, L), f32),
                   jax.ShapeDtypeStruct((B, 1, L), f32)),
        grid=(B, H),
        in_specs=[
            pl.BlockSpec((1, L, E), lambda b, h: (b, 0, 0)),     # x
            pl.BlockSpec((E, E), lambda b, h: (0, 0)),           # w1t
            pl.BlockSpec((1, E), lambda b, h: (0, 0)),           # b1
            pl.BlockSpec((E, E), lambda b, h: (0, 0)),           # w2t
            pl.BlockSpec((1, E), lambda b, h: (0, 0)),           # b2
            pl.BlockSpec((E, K * H), lambda b, h: (0, 0)),       # w3 (all taps)
            pl.BlockSpec((1, H), lambda b, h: (0, 0)),           # b3
        ],
        out_specs=(
            pl.BlockSpec((1, L, L), lambda b, h: (b * H + h, 0, 0)),  # gate
            pl.BlockSpec((1, 1, L), lambda b, h: (b, 0, 0)),          # distance
        ),
        scratch_shapes=[
            pltpu.VMEM((H, L, 1), f32),            # per-head distance columns
            pltpu.VMEM((H, 1, L), f32),            # per-head distance rows
            pltpu.VMEM((K, L + K - 1, H), f32),    # zero-padded conv taps
        ],
        compiler_params=pltpu.CompilerParams(
            dimension_semantics=("parallel", "arbitrary"),
            vmem_limit_bytes=vmem_limit),
    )(x.astype(f32), w1t, b1r, w2t, b2r, w3t, b3r)

    # lane-dense (B, 1, L) -> module layout (B, L, 1)
    return gate, dist.reshape(B, L, 1)


# ---------------------------- pure-JAX reference ----------------------------
def reference_forward(x, w1, b1, w2, b2, w3, b3, H, K, tau):
    B, L, E = x.shape
    xt = jnp.transpose(x, (0, 2, 1))                                 # (B, E, L)
    h = _gelu_exact(jnp.einsum('oi,bil->bol', w1[:, :, 0], xt) + b1[None, :, None])
    h = _gelu_exact(jnp.einsum('oi,bil->bol', w2[:, :, 0], h) + b2[None, :, None])
    hp = jnp.pad(h, ((0, 0), (0, 0), (K, K)))                        # pad = K
    win = jnp.stack([hp[:, :, k:k + L + K + 1] for k in range(K)], axis=-1)
    conv = jnp.einsum('hek,betk->bht', w3, win) + b3[None, :, None]  # (B,H,L+K+1)
    d = jnp.tanh(conv[:, :, 1:-K])                                   # (B, H, L)
    d_flat = d.reshape(B * H, L, 1)
    diff = d_flat - jnp.transpose(d_flat, (0, 2, 1))
    alpha = (jnp.clip(diff * tau, -1.0, 1.0) + 1.0) / 2.0
    dist_out = d.reshape(B, H, L, 1).mean(axis=1)
    ones = jnp.ones_like(alpha)
    m_low = jnp.tril(alpha, k=-1) + jnp.triu(ones, k=0)
    lower = jnp.flip(jnp.cumprod(jnp.flip(m_low, axis=-1), axis=-1), axis=-1)
    m_up = jnp.tril(ones, k=0) + jnp.triu(alpha, k=1)
    upper = jnp.cumprod(m_up, axis=-1)
    return lower * upper, dist_out


if __name__ == "__main__":
    B, L, E, H, K = 2, 8, 32, 2, 3
    tau = 1.0

    key = jax.random.PRNGKey(0)
    kx, k1, k2, k3, k4, k5, k6 = jax.random.split(key, 7)
    x = jax.random.normal(kx, (B, L, E), jnp.float32)
    w1 = jax.random.normal(k1, (E, E, 1), jnp.float32) / math.sqrt(E)
    b1 = jax.random.normal(k2, (E,), jnp.float32) * 0.1
    w2 = jax.random.normal(k3, (E, E, 1), jnp.float32) / math.sqrt(E)
    b2 = jax.random.normal(k4, (E,), jnp.float32) * 0.1
    w3 = jax.random.normal(k5, (H, E, K), jnp.float32) / math.sqrt(E * K)
    b3 = jax.random.normal(k6, (H,), jnp.float32) * 0.1

    gate, dist = syntactic_distance_gate(
        x, w1, b1, w2, b2, w3, b3,
        num_gate_heads=H, lookback_range=K, tau=tau)
    jax.block_until_ready((gate, dist))

    gate_ref, dist_ref = reference_forward(x, w1, b1, w2, b2, w3, b3, H, K, tau)
    assert gate.shape == (B * H, L, L) and dist.shape == (B, L, 1)
    assert jnp.allclose(gate, gate_ref, atol=1e-4, rtol=1e-4), "gate mismatch"
    assert jnp.allclose(dist, dist_ref, atol=1e-4, rtol=1e-4), "distance mismatch"

    print("KERNEL_OK")
</pallas_src>

<mosaic_0001>
module attributes {stable_mosaic.version = 11 : i64} {
  func.func @_sdg_kernel(%arg0: i32, %arg1: i32, %arg2: memref<1x8x32xf32, #tpu.memory_space<vmem>>, %arg3: memref<32x32xf32, #tpu.memory_space<vmem>>, %arg4: memref<1x32xf32, #tpu.memory_space<vmem>>, %arg5: memref<32x32xf32, #tpu.memory_space<vmem>>, %arg6: memref<1x32xf32, #tpu.memory_space<vmem>>, %arg7: memref<32x6xf32, #tpu.memory_space<vmem>>, %arg8: memref<1x2xf32, #tpu.memory_space<vmem>>, %arg9: memref<1x8x8xf32, #tpu.memory_space<vmem>>, %arg10: memref<1x1x8xf32, #tpu.memory_space<vmem>>, %arg11: memref<2x8x1xf32, #tpu.memory_space<vmem>>, %arg12: memref<2x1x8xf32, #tpu.memory_space<vmem>>, %arg13: memref<3x10x2xf32, #tpu.memory_space<vmem>>) attributes {dimension_semantics = [#tpu.dimension_semantics<parallel>, #tpu.dimension_semantics<arbitrary>], iteration_bounds = array<i64: 2, 2>, scalar_prefetch = 0 : i64, scratch_operands = 3 : i64, tpu.core_type = #tpu.core_type<tc>, window_params = [{transform_indices = @transform_0, window_bounds = array<i64: 1, 8, 32>}, {pipeline_mode = #tpu.pipeline_mode<synchronous>, transform_indices = @transform_1, window_bounds = array<i64: 32, 32>}, {pipeline_mode = #tpu.pipeline_mode<synchronous>, transform_indices = @transform_2, window_bounds = array<i64: 1, 32>}, {pipeline_mode = #tpu.pipeline_mode<synchronous>, transform_indices = @transform_3, window_bounds = array<i64: 32, 32>}, {pipeline_mode = #tpu.pipeline_mode<synchronous>, transform_indices = @transform_4, window_bounds = array<i64: 1, 32>}, {pipeline_mode = #tpu.pipeline_mode<synchronous>, transform_indices = @transform_5, window_bounds = array<i64: 32, 6>}, {pipeline_mode = #tpu.pipeline_mode<synchronous>, transform_indices = @transform_6, window_bounds = array<i64: 1, 2>}, {transform_indices = @transform_7, window_bounds = array<i64: 1, 8, 8>}, {transform_indices = @transform_8, window_bounds = array<i64: 1, 1, 8>}]} {
    %0 = tpu.iota {dimensions = array<i32: 0>} : vector<8x8xi32>
    %1 = tpu.iota {dimensions = array<i32: 1>} : vector<8x8xi32>
    %c0_i32 = arith.constant 0 : i32
    %2 = arith.cmpi eq, %arg1, %c0_i32 : i32
    %3 = arith.extui %2 : i1 to i32
    %c0_i32_0 = arith.constant 0 : i32
    %4 = arith.cmpi ne, %3, %c0_i32_0 : i32
    scf.if %4 {
      %c0_16 = arith.constant 0 : index
      %c0_17 = arith.constant 0 : index
      %c0_18 = arith.constant 0 : index
      %47 = vector.load %arg2[%c0_16, %c0_17, %c0_18] : memref<1x8x32xf32, #tpu.memory_space<vmem>>, vector<1x8x32xf32>
      %48 = vector.shape_cast %47 : vector<1x8x32xf32> to vector<8x32xf32>
      %c0_19 = arith.constant 0 : index
      %c0_20 = arith.constant 0 : index
      %49 = vector.load %arg3[%c0_19, %c0_20] : memref<32x32xf32, #tpu.memory_space<vmem>>, vector<32x32xf32>
      %cst_21 = arith.constant dense<0.000000e+00> : vector<8x32xf32>
      %50 = tpu.matmul %48, %49, %cst_21 {dimension_numbers = #tpu.dot_dimension_numbers<[1], [0], [0], [1], [0, 0, 1, 1], [], []>} : vector<8x32xf32>, vector<32x32xf32>, vector<8x32xf32> -> vector<8x32xf32>
      %c0_22 = arith.constant 0 : index
      %c0_23 = arith.constant 0 : index
      %51 = vector.load %arg4[%c0_22, %c0_23] : memref<1x32xf32, #tpu.memory_space<vmem>>, vector<1x32xf32>
      %52 = vector.broadcast %51 : vector<1x32xf32> to vector<8x32xf32>
      %53 = arith.addf %50, %52 : vector<8x32xf32>
      %cst_24 = arith.constant 5.000000e-01 : f32
      %54 = vector.broadcast %cst_24 : f32 to vector<8x32xf32>
      %55 = arith.mulf %54, %53 : vector<8x32xf32>
      %cst_25 = arith.constant 0.707106769 : f32
      %56 = vector.broadcast %cst_25 : f32 to vector<8x32xf32>
      %57 = arith.mulf %53, %56 : vector<8x32xf32>
      %58 = math.erf %57 : vector<8x32xf32>
      %cst_26 = arith.constant 1.000000e+00 : f32
      %59 = vector.broadcast %cst_26 : f32 to vector<8x32xf32>
      %60 = arith.addf %59, %58 : vector<8x32xf32>
      %61 = arith.mulf %55, %60 : vector<8x32xf32>
      %c0_27 = arith.constant 0 : index
      %c0_28 = arith.constant 0 : index
      %62 = vector.load %arg5[%c0_27, %c0_28] : memref<32x32xf32, #tpu.memory_space<vmem>>, vector<32x32xf32>
      %cst_29 = arith.constant dense<0.000000e+00> : vector<8x32xf32>
      %63 = tpu.matmul %61, %62, %cst_29 {dimension_numbers = #tpu.dot_dimension_numbers<[1], [0], [0], [1], [0, 0, 1, 1], [], []>} : vector<8x32xf32>, vector<32x32xf32>, vector<8x32xf32> -> vector<8x32xf32>
      %c0_30 = arith.constant 0 : index
      %c0_31 = arith.constant 0 : index
      %64 = vector.load %arg6[%c0_30, %c0_31] : memref<1x32xf32, #tpu.memory_space<vmem>>, vector<1x32xf32>
      %65 = vector.broadcast %64 : vector<1x32xf32> to vector<8x32xf32>
      %66 = arith.addf %63, %65 : vector<8x32xf32>
      %cst_32 = arith.constant 5.000000e-01 : f32
      %67 = vector.broadcast %cst_32 : f32 to vector<8x32xf32>
      %68 = arith.mulf %67, %66 : vector<8x32xf32>
      %cst_33 = arith.constant 0.707106769 : f32
      %69 = vector.broadcast %cst_33 : f32 to vector<8x32xf32>
      %70 = arith.mulf %66, %69 : vector<8x32xf32>
      %71 = math.erf %70 : vector<8x32xf32>
      %cst_34 = arith.constant 1.000000e+00 : f32
      %72 = vector.broadcast %cst_34 : f32 to vector<8x32xf32>
      %73 = arith.addf %72, %71 : vector<8x32xf32>
      %74 = arith.mulf %68, %73 : vector<8x32xf32>
      %c0_35 = arith.constant 0 : index
      %c0_36 = arith.constant 0 : index
      %75 = vector.load %arg7[%c0_35, %c0_36] : memref<32x6xf32, #tpu.memory_space<vmem>>, vector<32x6xf32>
      %cst_37 = arith.constant dense<0.000000e+00> : vector<8x6xf32>
      %76 = tpu.matmul %74, %75, %cst_37 {dimension_numbers = #tpu.dot_dimension_numbers<[1], [0], [0], [1], [0, 0, 1, 1], [], []>} : vector<8x32xf32>, vector<32x6xf32>, vector<8x6xf32> -> vector<8x6xf32>
      %77 = vector.extract_strided_slice %76 {offsets = [0, 0], sizes = [8, 2], strides = [1, 1]} : vector<8x6xf32> to vector<8x2xf32>
      %c0_38 = arith.constant 0 : index
      %c2 = arith.constant 2 : index
      %c0_39 = arith.constant 0 : index
      %78 = vector.load %arg13[%c0_38, %c2, %c0_39] : memref<3x10x2xf32, #tpu.memory_space<vmem>>, vector<1x8x2xf32>
      %79 = vector.shape_cast %78 : vector<1x8x2xf32> to vector<8x2xf32>
      %80 = vector.shape_cast %77 : vector<8x2xf32> to vector<1x8x2xf32>
      tpu.vector_store %arg13[%c0_38, %c2, %c0_39], %80 {strides = array<i32>} : memref<3x10x2xf32, #tpu.memory_space<vmem>>, vector<1x8x2xf32>,
      %cst_40 = arith.constant 0.000000e+00 : f32
      %81 = vector.broadcast %cst_40 : f32 to vector<2x2xf32>
      %c0_41 = arith.constant 0 : index
      %c0_42 = arith.constant 0 : index
      %c0_43 = arith.constant 0 : index
      %82 = vector.load %arg13[%c0_41, %c0_42, %c0_43] : memref<3x10x2xf32, #tpu.memory_space<vmem>>, vector<1x2x2xf32>
      %83 = vector.shape_cast %82 : vector<1x2x2xf32> to vector<2x2xf32>
      %84 = vector.shape_cast %81 : vector<2x2xf32> to vector<1x2x2xf32>
      tpu.vector_store %arg13[%c0_41, %c0_42, %c0_43], %84 {strides = array<i32>} : memref<3x10x2xf32, #tpu.memory_space<vmem>>, vector<1x2x2xf32>,
      %85 = vector.extract_strided_slice %76 {offsets = [0, 2], sizes = [8, 2], strides = [1, 1]} : vector<8x6xf32> to vector<8x2xf32>
      %c1 = arith.constant 1 : index
      %c2_44 = arith.constant 2 : index
      %c0_45 = arith.constant 0 : index
      %86 = vector.load %arg13[%c1, %c2_44, %c0_45] : memref<3x10x2xf32, #tpu.memory_space<vmem>>, vector<1x8x2xf32>
      %87 = vector.shape_cast %86 : vector<1x8x2xf32> to vector<8x2xf32>
      %88 = vector.shape_cast %85 : vector<8x2xf32> to vector<1x8x2xf32>
      tpu.vector_store %arg13[%c1, %c2_44, %c0_45], %88 {strides = array<i32>} : memref<3x10x2xf32, #tpu.memory_space<vmem>>, vector<1x8x2xf32>,
      %cst_46 = arith.constant 0.000000e+00 : f32
      %89 = vector.broadcast %cst_46 : f32 to vector<2x2xf32>
      %c1_47 = arith.constant 1 : index
      %c0_48 = arith.constant 0 : index
      %c0_49 = arith.constant 0 : index
      %90 = vector.load %arg13[%c1_47, %c0_48, %c0_49] : memref<3x10x2xf32, #tpu.memory_space<vmem>>, vector<1x2x2xf32>
      %91 = vector.shape_cast %90 : vector<1x2x2xf32> to vector<2x2xf32>
      %92 = vector.shape_cast %89 : vector<2x2xf32> to vector<1x2x2xf32>
      tpu.vector_store %arg13[%c1_47, %c0_48, %c0_49], %92 {strides = array<i32>} : memref<3x10x2xf32, #tpu.memory_space<vmem>>, vector<1x2x2xf32>,
      %93 = vector.extract_strided_slice %76 {offsets = [0, 4], sizes = [8, 2], strides = [1, 1]} : vector<8x6xf32> to vector<8x2xf32>
      %c2_50 = arith.constant 2 : index
      %c2_51 = arith.constant 2 : index
      %c0_52 = arith.constant 0 : index
      %94 = vector.load %arg13[%c2_50, %c2_51, %c0_52] : memref<3x10x2xf32, #tpu.memory_space<vmem>>, vector<1x8x2xf32>
      %95 = vector.shape_cast %94 : vector<1x8x2xf32> to vector<8x2xf32>
      %96 = vector.shape_cast %93 : vector<8x2xf32> to vector<1x8x2xf32>
      tpu.vector_store %arg13[%c2_50, %c2_51, %c0_52], %96 {strides = array<i32>} : memref<3x10x2xf32, #tpu.memory_space<vmem>>, vector<1x8x2xf32>,
      %c2_53 = arith.constant 2 : index
      %c2_54 = arith.constant 2 : index
      %c0_55 = arith.constant 0 : index
      %97 = vector.load %arg13[%c2_53, %c2_54, %c0_55] : memref<3x10x2xf32, #tpu.memory_space<vmem>>, vector<1x8x2xf32>
      %98 = vector.shape_cast %97 : vector<1x8x2xf32> to vector<8x2xf32>
      %c0_56 = arith.constant 0 : index
      %c0_57 = arith.constant 0 : index
      %c0_58 = arith.constant 0 : index
      %99 = vector.load %arg13[%c0_56, %c0_57, %c0_58] : memref<3x10x2xf32, #tpu.memory_space<vmem>>, vector<1x8x2xf32>
      %100 = vector.shape_cast %99 : vector<1x8x2xf32> to vector<8x2xf32>
      %101 = arith.addf %98, %100 : vector<8x2xf32>
      %c1_59 = arith.constant 1 : index
      %c1_60 = arith.constant 1 : index
      %c0_61 = arith.constant 0 : index
      %102 = vector.load %arg13[%c1_59, %c1_60, %c0_61] : memref<3x10x2xf32, #tpu.memory_space<vmem>>, vector<1x8x2xf32>
      %103 = vector.shape_cast %102 : vector<1x8x2xf32> to vector<8x2xf32>
      %104 = arith.addf %101, %103 : vector<8x2xf32>
      %c0_62 = arith.constant 0 : index
      %c0_63 = arith.constant 0 : index
      %105 = vector.load %arg8[%c0_62, %c0_63] : memref<1x2xf32, #tpu.memory_space<vmem>>, vector<1x2xf32>
      %106 = vector.broadcast %105 : vector<1x2xf32> to vector<8x2xf32>
      %107 = arith.addf %104, %106 : vector<8x2xf32>
      %108 = math.tanh %107 : vector<8x2xf32>
      %109 = arith.cmpi eq, %0, %1 : vector<8x8xi32>
      %110 = arith.extui %109 : vector<8x8xi1> to vector<8x8xi32>
      %111 = arith.sitofp %110 : vector<8x8xi32> to vector<8x8xf32>
      %cst_64 = arith.constant 0.000000e+00 : f32
      %112 = vector.broadcast %cst_64 : f32 to vector<1x8xf32>
      %113 = vector.extract_strided_slice %108 {offsets = [0, 0], sizes = [8, 1], strides = [1, 1]} : vector<8x2xf32> to vector<8x1xf32>
      %114 = vector.broadcast %113 : vector<8x1xf32> to vector<8x8xf32>
      %115 = arith.mulf %114, %111 : vector<8x8xf32>
      %cst_65 = arith.constant dense<0.000000e+00> : vector<8xf32>
      %116 = vector.multi_reduction <add>, %115, %cst_65 [0] : vector<8x8xf32> to vector<8xf32>
      %117 = vector.shape_cast %116 : vector<8xf32> to vector<1x8xf32>
      %c0_66 = arith.constant 0 : index
      %c0_67 = arith.constant 0 : index
      %c0_68 = arith.constant 0 : index
      %118 = vector.load %arg11[%c0_66, %c0_67, %c0_68] : memref<2x8x1xf32, #tpu.memory_space<vmem>>, vector<1x8x1xf32>
      %119 = vector.shape_cast %118 : vector<1x8x1xf32> to vector<8x1xf32>
      %120 = vector.shape_cast %113 : vector<8x1xf32> to vector<1x8x1xf32>
      tpu.vector_store %arg11[%c0_66, %c0_67, %c0_68], %120 {strides = array<i32>} : memref<2x8x1xf32, #tpu.memory_space<vmem>>, vector<1x8x1xf32>,
      %c0_69 = arith.constant 0 : index
      %c0_70 = arith.constant 0 : index
      %c0_71 = arith.constant 0 : index
      %121 = vector.load %arg12[%c0_69, %c0_70, %c0_71] : memref<2x1x8xf32, #tpu.memory_space<vmem>>, vector<1x1x8xf32>
      %122 = vector.shape_cast %121 : vector<1x1x8xf32> to vector<1x8xf32>
      %123 = vector.shape_cast %117 : vector<1x8xf32> to vector<1x1x8xf32>
      tpu.vector_store %arg12[%c0_69, %c0_70, %c0_71], %123 {strides = array<i32>} : memref<2x1x8xf32, #tpu.memory_space<vmem>>, vector<1x1x8xf32>,
      %124 = arith.addf %112, %117 : vector<1x8xf32>
      %125 = vector.extract_strided_slice %108 {offsets = [0, 1], sizes = [8, 1], strides = [1, 1]} : vector<8x2xf32> to vector<8x1xf32>
      %126 = vector.broadcast %125 : vector<8x1xf32> to vector<8x8xf32>
      %127 = arith.mulf %126, %111 : vector<8x8xf32>
      %cst_72 = arith.constant dense<0.000000e+00> : vector<8xf32>
      %128 = vector.multi_reduction <add>, %127, %cst_72 [0] : vector<8x8xf32> to vector<8xf32>
      %129 = vector.shape_cast %128 : vector<8xf32> to vector<1x8xf32>
      %c1_73 = arith.constant 1 : index
      %c0_74 = arith.constant 0 : index
      %c0_75 = arith.constant 0 : index
      %130 = vector.load %arg11[%c1_73, %c0_74, %c0_75] : memref<2x8x1xf32, #tpu.memory_space<vmem>>, vector<1x8x1xf32>
      %131 = vector.shape_cast %130 : vector<1x8x1xf32> to vector<8x1xf32>
      %132 = vector.shape_cast %125 : vector<8x1xf32> to vector<1x8x1xf32>
      tpu.vector_store %arg11[%c1_73, %c0_74, %c0_75], %132 {strides = array<i32>} : memref<2x8x1xf32, #tpu.memory_space<vmem>>, vector<1x8x1xf32>,
      %c1_76 = arith.constant 1 : index
      %c0_77 = arith.constant 0 : index
      %c0_78 = arith.constant 0 : index
      %133 = vector.load %arg12[%c1_76, %c0_77, %c0_78] : memref<2x1x8xf32, #tpu.memory_space<vmem>>, vector<1x1x8xf32>
      %134 = vector.shape_cast %133 : vector<1x1x8xf32> to vector<1x8xf32>
      %135 = vector.shape_cast %129 : vector<1x8xf32> to vector<1x1x8xf32>
      tpu.vector_store %arg12[%c1_76, %c0_77, %c0_78], %135 {strides = array<i32>} : memref<2x1x8xf32, #tpu.memory_space<vmem>>, vector<1x1x8xf32>,
      %136 = arith.addf %124, %129 : vector<1x8xf32>
      %cst_79 = arith.constant 5.000000e-01 : f32
      %137 = vector.broadcast %cst_79 : f32 to vector<1x8xf32>
      %138 = arith.mulf %136, %137 : vector<1x8xf32>
      %c0_80 = arith.constant 0 : index
      %c0_81 = arith.constant 0 : index
      %c0_82 = arith.constant 0 : index
      %139 = vector.load %arg10[%c0_80, %c0_81, %c0_82] : memref<1x1x8xf32, #tpu.memory_space<vmem>>, vector<1x1x8xf32>
      %140 = vector.shape_cast %139 : vector<1x1x8xf32> to vector<1x8xf32>
      %141 = vector.shape_cast %138 : vector<1x8xf32> to vector<1x1x8xf32>
      tpu.vector_store %arg10[%c0_80, %c0_81, %c0_82], %141 {strides = array<i32>} : memref<1x1x8xf32, #tpu.memory_space<vmem>>, vector<1x1x8xf32>,
    } else {
    }
    %5 = arith.index_cast %arg1 : i32 to index
    %c0 = arith.constant 0 : index
    %c0_1 = arith.constant 0 : index
    %6 = vector.load %arg11[%5, %c0, %c0_1] : memref<2x8x1xf32, #tpu.memory_space<vmem>>, vector<1x8x1xf32>
    %7 = vector.shape_cast %6 : vector<1x8x1xf32> to vector<8x1xf32>
    %8 = arith.index_cast %arg1 : i32 to index
    %c0_2 = arith.constant 0 : index
    %c0_3 = arith.constant 0 : index
    %9 = vector.load %arg12[%8, %c0_2, %c0_3] : memref<2x1x8xf32, #tpu.memory_space<vmem>>, vector<1x1x8xf32>
    %10 = vector.shape_cast %9 : vector<1x1x8xf32> to vector<1x8xf32>
    %11 = vector.broadcast %7 : vector<8x1xf32> to vector<8x8xf32>
    %12 = vector.broadcast %10 : vector<1x8xf32> to vector<8x8xf32>
    %13 = arith.subf %11, %12 : vector<8x8xf32>
    %cst = arith.constant 1.000000e+00 : f32
    %14 = vector.broadcast %cst : f32 to vector<8x8xf32>
    %15 = arith.mulf %13, %14 : vector<8x8xf32>
    %cst_4 = arith.constant -1.000000e+00 : f32
    %cst_5 = arith.constant 1.000000e+00 : f32
    %16 = vector.broadcast %cst_4 : f32 to vector<8x8xf32>
    %17 = arith.maximumf %16, %15 : vector<8x8xf32>
    %18 = vector.broadcast %cst_5 : f32 to vector<8x8xf32>
    %19 = arith.minimumf %18, %17 : vector<8x8xf32>
    %cst_6 = arith.constant 1.000000e+00 : f32
    %20 = vector.broadcast %cst_6 : f32 to vector<8x8xf32>
    %21 = arith.addf %19, %20 : vector<8x8xf32>
    %cst_7 = arith.constant 5.000000e-01 : f32
    %22 = vector.broadcast %cst_7 : f32 to vector<8x8xf32>
    %23 = arith.mulf %21, %22 : vector<8x8xf32>
    %24 = math.log %23 : vector<8x8xf32>
    %cst_8 = arith.constant -1.000000e+30 : f32
    %25 = vector.broadcast %cst_8 : f32 to vector<8x8xf32>
    %26 = arith.maximumf %24, %25 : vector<8x8xf32>
    %27 = arith.cmpi slt, %1, %0 : vector<8x8xi32>
    %cst_9 = arith.constant 0.000000e+00 : f32
    %28 = vector.broadcast %cst_9 : f32 to vector<8x8xf32>
    %29 = arith.select %27, %26, %28 : vector<8x8xi1>, vector<8x8xf32>
    %30 = arith.cmpi sgt, %1, %0 : vector<8x8xi32>
    %cst_10 = arith.constant 0.000000e+00 : f32
    %31 = vector.broadcast %cst_10 : f32 to vector<8x8xf32>
    %32 = arith.select %30, %26, %31 : vector<8x8xi1>, vector<8x8xf32>
    %33 = arith.cmpi sge, %0, %1 : vector<8x8xi32>
    %34 = arith.extui %33 : vector<8x8xi1> to vector<8x8xi32>
    %35 = arith.sitofp %34 : vector<8x8xi32> to vector<8x8xf32>
    %36 = arith.cmpi sle, %0, %1 : vector<8x8xi32>
    %37 = arith.extui %36 : vector<8x8xi1> to vector<8x8xi32>
    %38 = arith.sitofp %37 : vector<8x8xi32> to vector<8x8xf32>
    %cst_11 = arith.constant dense<0.000000e+00> : vector<8x8xf32>
    %39 = tpu.matmul %29, %35, %cst_11 {dimension_numbers = #tpu.dot_dimension_numbers<[1], [0], [0], [1], [0, 0, 1, 1], [], []>} : vector<8x8xf32>, vector<8x8xf32>, vector<8x8xf32> -> vector<8x8xf32>
    %40 = math.exp %39 : vector<8x8xf32>
    %cst_12 = arith.constant dense<0.000000e+00> : vector<8x8xf32>
    %41 = tpu.matmul %32, %38, %cst_12 {dimension_numbers = #tpu.dot_dimension_numbers<[1], [0], [0], [1], [0, 0, 1, 1], [], []>} : vector<8x8xf32>, vector<8x8xf32>, vector<8x8xf32> -> vector<8x8xf32>
    %42 = math.exp %41 : vector<8x8xf32>
    %43 = arith.mulf %40, %42 : vector<8x8xf32>
    %c0_13 = arith.constant 0 : index
    %c0_14 = arith.constant 0 : index
    %c0_15 = arith.constant 0 : index
    %44 = vector.load %arg9[%c0_13, %c0_14, %c0_15] : memref<1x8x8xf32, #tpu.memory_space<vmem>>, vector<1x8x8xf32>
    %45 = vector.shape_cast %44 : vector<1x8x8xf32> to vector<8x8xf32>
    %46 = vector.shape_cast %43 : vector<8x8xf32> to vector<1x8x8xf32>
    tpu.vector_store %arg9[%c0_13, %c0_14, %c0_15], %46 {strides = array<i32>} : memref<1x8x8xf32, #tpu.memory_space<vmem>>, vector<1x8x8xf32>,
    return
  }
  func.func @transform_0(%arg0: i32, %arg1: i32) -> (i32, i32, i32) {
    %c0_i32 = arith.constant 0 : i32
    %c0_i32_0 = arith.constant 0 : i32
    %c0_i32_1 = arith.constant 0 : i32
    return %arg0, %c0_i32, %c0_i32_0 : i32, i32, i32
  }
  func.func @transform_1(%arg0: i32, %arg1: i32) -> (i32, i32) {
    %c0_i32 = arith.constant 0 : i32
    %c0_i32_0 = arith.constant 0 : i32
    %c0_i32_1 = arith.constant 0 : i32
    return %c0_i32, %c0_i32_0 : i32, i32
  }
  func.func @transform_2(%arg0: i32, %arg1: i32) -> (i32, i32) {
    %c0_i32 = arith.constant 0 : i32
    %c0_i32_0 = arith.constant 0 : i32
    %c0_i32_1 = arith.constant 0 : i32
    return %c0_i32, %c0_i32_0 : i32, i32
  }
  func.func @transform_3(%arg0: i32, %arg1: i32) -> (i32, i32) {
    %c0_i32 = arith.constant 0 : i32
    %c0_i32_0 = arith.constant 0 : i32
    %c0_i32_1 = arith.constant 0 : i32
    return %c0_i32, %c0_i32_0 : i32, i32
  }
  func.func @transform_4(%arg0: i32, %arg1: i32) -> (i32, i32) {
    %c0_i32 = arith.constant 0 : i32
    %c0_i32_0 = arith.constant 0 : i32
    %c0_i32_1 = arith.constant 0 : i32
    return %c0_i32, %c0_i32_0 : i32, i32
  }
  func.func @transform_5(%arg0: i32, %arg1: i32) -> (i32, i32) {
    %c0_i32 = arith.constant 0 : i32
    %c0_i32_0 = arith.constant 0 : i32
    %c0_i32_1 = arith.constant 0 : i32
    return %c0_i32, %c0_i32_0 : i32, i32
  }
  func.func @transform_6(%arg0: i32, %arg1: i32) -> (i32, i32) {
    %c0_i32 = arith.constant 0 : i32
    %c0_i32_0 = arith.constant 0 : i32
    %c0_i32_1 = arith.constant 0 : i32
    return %c0_i32, %c0_i32_0 : i32, i32
  }
  func.func @transform_7(%arg0: i32, %arg1: i32) -> (i32, i32, i32) {
    %c2_i32 = arith.constant 2 : i32
    %0 = arith.muli %arg0, %c2_i32 : i32
    %1 = arith.addi %0, %arg1 : i32
    %c0_i32 = arith.constant 0 : i32
    %c0_i32_0 = arith.constant 0 : i32
    %c0_i32_1 = arith.constant 0 : i32
    return %1, %c0_i32, %c0_i32_0 : i32, i32, i32
  }
  func.func @transform_8(%arg0: i32, %arg1: i32) -> (i32, i32, i32) {
    %c0_i32 = arith.constant 0 : i32
    %c0_i32_0 = arith.constant 0 : i32
    %c0_i32_1 = arith.constant 0 : i32
    return %arg0, %c0_i32, %c0_i32_0 : i32, i32, i32
  }
}

</mosaic_0001>

<bundles_post_ra>
// kernel: tpu_custom_call.1
= control target key start
LH: loop header
LB: loop body
LE: loop exit
PB: predicated region body
PF: predicated region fallthrough
CT: control target
= control target key end

     0   :  { %s1634_s0 = inlined_call_operand.hbm [shape: f32[2,8,32], index: 0, kind: input, shape index: {}]   ;;  %s1635_s1 = inlined_call_operand.vmem [shape: f32[32,32], index: 1, kind: input, shape index: {}]   ;;  %s1636_s2 = inlined_call_operand.vmem [shape: f32[1,32], index: 2, kind: input, shape index: {}]   ;;  %s1637_s3 = inlined_call_operand.hbm [shape: f32[32,32], index: 3, kind: input, shape index: {}]   ;;  %s1638_s4 = inlined_call_operand.vmem [shape: f32[1,32], index: 4, kind: input, shape index: {}]   ;;  %s1639_s5 = inlined_call_operand.vmem [shape: f32[32,6], index: 5, kind: input, shape index: {}]   ;;  %s1640_s6 = inlined_call_operand.vmem [shape: f32[1,2], index: 6, kind: input, shape index: {}]   ;;  %s1641_s7 = inlined_call_operand.hbm [shape: f32[4,8,8], index: 7, kind: output, shape index: {0}]   ;;  %s1642_s8 = inlined_call_operand.hbm [shape: f32[2,1,8], index: 8, kind: output, shape index: {1}]  }
   0x1   :  { %1656 = sst [smem:[#allocation25_spill]] %s1634_s0 }
   0x2   :  { %1657 = sst [smem:[#allocation26_spill]] %s1635_s1 }
   0x3   :  { %1658 = sst [smem:[#allocation27_spill]] %s1637_s3 }
   0x4   :  { %1659 = sst [smem:[#allocation28_spill]] %s1640_s6 }
   0x5   :  { %1660 = sst [smem:[#allocation29_spill]] %s1641_s7 }
   0x6   :  { %1661 = sst [smem:[#allocation30_spill]] %s1642_s8 }
   0x7   :  { %14 = vsyncpa [#allocation6], 0 }
   0x8   :  { %16 = vsyncpa [#allocation6 + $0x1], 0 }
   0x9   :  { %17 = vsyncpa [#allocation9], 0 }
   0xa   :  { %18 = vsyncpa [#allocation7], 0 }
   0xb   :  { %20 = vsyncpa [#allocation7 + $0x1], 0 }
   0xc   :  { %21 = vsyncpa [#allocation12], 0 }
   0xd   :  { %23 = vsyncpa [#allocation12 + $0x1], 0  ;;  %s1326_s27 = smov 0   ;;  %s1328_s28 = smov 0  }
   0xe   :  { %s1330_s29 = smov 0   ;;  %s1332_s30 = smov 0  }
   0xf   :  { %s1334_s9 = smov 0   ;;  %s1336_s10 = smov 0  }
  0x10   :  { %s1338_s11 = smov 0   ;;  %s1340_s12 = smov 0  }
  0x11   :  { %s1342_s13 = smov 0   ;;  %s1344_s14 = smov 0  }
  0x12   :  { %s1346_s15 = smov 0  }
  0x13 LB: > { %1662 = sst [smem:[#allocation17_spill]] %s1248_s10  ;;  %s1643_s16 = sadd.s32 4294967295, %s1268_s15   ;;  %s1268_s15 = sphi %s1346_s15, %s29_s15   ;;  %s1264_s14 = sphi %s1344_s14, %s1697_s14   ;;  %s1260_s13 = sphi %s1342_s13, %s1696_s13   ;;  %s1256_s12 = sphi %s1340_s12, %s1695_s12   ;;  %s1252_s11 = sphi %s1338_s11, %s1694_s11   ;;  %s1248_s10 = sphi %s1336_s10, %s1693_s10   ;;  %s1244_s9 = sphi %s1334_s9, %s1702_s9   ;;  %s1240_s30 = sphi %s1332_s30, %s1701_s30   ;;  %s1236_s29 = sphi %s1330_s29, %s1700_s29   ;;  %s1232_s28 = sphi %s1328_s28, %s1699_s28   ;;  %s1228_s27 = sphi %s1326_s27, %s1698_s27  }
  0x14   : > { %1663 = sst [smem:[#allocation18_spill]] %s1256_s12  ;;  %p873_p0 = scmp.ge.s32.totalorder %s1268_s15, 1 }
  0x15   : > { %1664 = sst [smem:[#allocation19_spill]] %s1260_s13  ;;  %p1385_p1 = scmp.eq.s32.totalorder %s1643_s16, 0 }
  0x16   : > { %1665 = sst [smem:[#allocation20_spill]] %s1264_s14  ;;  %p254_p2 = scmp.lt.s32.totalorder %s1268_s15, 5 }
  0x17   : > { %s1666_s17 = scalar_select %p1385_p1, 1, 0 }
  0x18   : > { %s1667_s3 = sld [smem:[#allocation27_spill]]  ;;  %p1393_p3 = pnand %p873_p0, %p254_p2 }
  0x19   : > { %s1270_s22 = smov [#allocation8]   ;;  %s1271_s24 = smov 128  }
  0x1a   : > { %p912_p4 = pneg %p1393_p3  ;;  %s273_s23 = sshll.u32 %s1270_s22, 4  ;;  %s274_s23 = int_to_ptr.vmem [resolvable:$true] %s273_s23 }
  0x1b   : > { %s1272_s25 = smov 8   ;;  %s870_s26 = sadd.s32 4294967294, %s1268_s15  }
  0x1c   : > { %p913_p5 = pnand %p912_p4, %p1385_p1  ;;  %s38_s18 = sadd.s32 1, %s1260_s13 }
  0x1d   : > { %p39_p6 = scmp.ge.s32.totalorder %s38_s18, 2  ;;  %s41_s19 = sadd.s32 1, %s1264_s14 }
  0x1e   : > { %s271_s20 = sshll.u32 %s1667_s3, 4  ;;  %s48_s22 = sadd.s32 1, %s1248_s10  ;;  %s272_s20 = int_to_ptr.hbm [resolvable:$true] %s271_s20 }
  0x1f   : > { %915 = dma.hbm_to_vmem [thread:$0]  (!%p913_p5), %s272_s20, 512, %s274_s23, [#allocation9], %s1271_s24, %s1271_s24, %s1272_s25  }
  0x20   : > { %p55_p7 = scmp.ne.s32.totalorder %s1248_s10, %s1244_s9  ;;  %s1704_s18 = smov (%p39_p6, %s38_s18), 0 }
  0x21   : > { %1669 = sst [smem:[#allocation21_spill]] %s1704_s18  ;;  %s1706_s19 = smov (!%p39_p6, %s41_s19), %s1264_s14 }
  0x22   : > { %p56_p8 = scmp.eq.s32.totalorder %s1268_s15, 0  ;;  %p1649_p9 = scmp.ne.s32.totalorder %s1244_s9, %s1240_s30 }
  0x23   : > { %p43_p10 = scmp.ge.s32.totalorder %s1706_s19, 2  ;;  %s871_s20 = sshll.u32 %s1264_s14, 1 }
  0x24   : > { %p1419_p11 = por %p1385_p1, %p1649_p9  ;;  %s198_s24 = sadd.s32 %s1260_s13, %s871_s20 }
  0x25   : > { %s1708_s19 = smov (%p43_p10, %s1706_s19), 0  ;;  %s204_s25 = sadd.s32 1, %s1236_s29 }
  0x26   : > { %1671 = sst [smem:[#allocation22_spill]] %s1708_s19  ;;  %p214_p12 = scmp.ne.s32.totalorder %s1236_s29, %s1232_s28 }
  0x27   : > { %s45_s16 = ssub.s32 %s1264_s14, %s1708_s19  ;;  %s872_s3 = sshll.u32 %s1708_s19, 1 }
  0x28   : > { %p46_p13 = scmp.eq.s32.totalorder %s45_s16, 0  ;;  %s200_s20 = sadd.s32 %s872_s3, %s1704_s18 }
  0x29   : > { %s201_s13 = ssub.s32 %s198_s24, %s200_s20  ;;  %s1672_s7 = sadd.s32 4294967295, %s1268_s15  }
  0x2a   : > { %p215_p0 = scmp.eq.s32.totalorder %s1672_s7, 3  ;;  %p202_p2 = scmp.eq.s32.totalorder %s201_s13, 0 }
  0x2b   : > { %s1436_s8 = scalar_select %p46_p13, %s1248_s10, %s48_s22  }
  0x2c   : > { %p1438_p4 = por %p215_p0, %p214_p12  ;;  %p220_p5 = scmp.ne.s32.totalorder %s1232_s28, %s1228_s27 }
  0x2d   : > { %1673 = sst [smem:[#allocation23_spill]] %s1436_s8  ;;  %p221_p6 = scmp.eq.s32.totalorder %s870_s26, 3 }
  0x2e   : > { %s1445_s6 = scalar_select %p202_p2, %s1236_s29, %s204_s25  }
  0x2f   : > { %p1447_p10 = por %p221_p6, %p220_p5  ;;  %p1454_p9 = por %p215_p0, %p55_p7 }
  0x30   : > { %1675 = sst [smem:[#allocation24_spill]] %s1445_s6  ;;  %p57_p13 = por %p56_p8, %p55_p7 }
  0x31   : > { %p1678_p12 = scmp.ne.s32.totalorder %s1244_s9, %s1240_s30  ;;  %s296_s13 = sand.u32 1, %s1248_s10  }
  0x32   : > { %s877_s16 = sshll.u32 %s1264_s14, 3  ;;  %p928_p2 = scmp.lt.s32.totalorder %s1268_s15, 4 }
  0x33   : > { %p1466_p1 = por %p221_p6, %p1678_p12  ;;  %s876_s26 = sshll.u32 %s296_s13, 3 }
  0x34   : > { %s1680_s0 = sld [smem:[#allocation25_spill]]  ;;  %s300_s18 = scalar_lea.vmem [#allocation5], %s876_s26 }
  0x35   : > { %s308_s8 = sshll.u32 %s300_s18, 4  ;;  %p917_p0 = pnand %p928_p2, %p57_p13  ;;  %s309_s8 = int_to_ptr.vmem [resolvable:$true] %s308_s8 }
  0x36   : > { %s297_s6 = scalar_lea.sflag [#allocation6], %s296_s13  ;;  %s1479_s14 = sand.u32 (!%p1393_p3), 1, %s1244_s9  }
  0x37   : > { %s879_s10 = sshll.u32 (!%p1393_p3), %s1479_s14, 3  ;;  %s320_s22 = scalar_lea.sflag (!%p1393_p3), [#allocation6], %s1479_s14 }
  0x38   : > { %317 = sbr.rel (%p1393_p3) target bundleno = 1136 (0x470), region = 48 }
  0x3a   : > { %s304_s25 = scalar_lea.hbm %s1680_s0, %s877_s16  ;;  %s323_s16 = scalar_lea.vmem (!%p1393_p3), [#allocation5], %s879_s10 }
  0x3b   : > { %s306_s20 = sshll.u32 %s304_s25, 4  ;;  %s307_s20 = int_to_ptr.hbm [resolvable:$true] %s306_s20 }
  0x3c   : > { %919 = dma.hbm_to_vmem [thread:$0]  (!%p917_p0), %s307_s20, 128, %s309_s8, %s297_s6  }
  0x3d   : > { %1211 = dma.done.wait (%p1419_p11), %s320_s22, 128  }
  0x3e   : > { %1213 = vsyncadd (%p1419_p11), %s320_s22, 4294967168  ;;  %p1681_p7 = scmp.ne.s32.totalorder %s1666_s17, 0 }
  0x40   : > { %1215 = dma.done.wait (%p1681_p7), [#allocation9], 512  }
  0x41   : > { %1217 = vsyncadd (%p1681_p7), [#allocation9], 4294966784  ;;  %s1655_s6 = sand.u32 1, %s1232_s28   ;;  %v368_v0 = vlaneseq  ;;  %s365_s21 = scalar_lea.vmem [#allocation11], %s1479_s14 }
  0x42   : > { %s1494_s8 = sshll.u32 %s1655_s6, 3  ;;  %p882_p3 = scmp.ne.s32.totalorder %s1252_s11, 0 }
  0x43   : > { %v1496_v1 = vshrl.u32 %v368_v0, 7  ;;  %v1498_v2 = vand.u32 127, %v368_v0  ;;  %s1682_s1 = sld [smem:[#allocation26_spill]] (!%p882_p3)  ;;  %s1275_s18 = smov (!%p882_p3), 126  }
  0x44   : > { %375 = sbr.rel (%p882_p3) target bundleno = 857 (0x359), region = 60  ;;  %s1683_s26 = sld [smem:[#allocation28_spill]] (!%p882_p3) }
  0x45   : > { %s1278_s24 = smov (!%p882_p3), 127  }
  0x49   : > { %v380_v3 = vld [vmem:[%s1682_s1 + $0x18] sm:$0xff]  ;;  %v379_v4 = vld [vmem:[%s1682_s1 + $0x10] sm:$0xff]  ;;  %v378_v5 = vld [vmem:[%s1682_s1 + $0x8] sm:$0xff]  ;;  %vm385_vm0 = vcmask 261120   ;;  %vm557_vm9 = vcmask 9216   ;;  %vm555_vm10 = vcmask 15360   ;;  %vm582_vm12 = vcmp.eq.s32.totalorder %v1496_v1, %v1498_v2 }
  0x4a   : > { %401 = vmatpush.msra.mxu0 %v380_v3  ;;  %v377_v6 = vld [vmem:[%s1682_s1] sm:$0xff]  ;;  %v456_v20 = vld [vmem:[#allocation8 + $0x18] sm:$0xff]  ;;  %v453_v26 = vld [vmem:[#allocation8] sm:$0xff]  ;;  %vm599_vm11 = vcmask 7168   ;;  %vm591_vm13 = vcmask 64512   ;;  %vm601_vm14 = vcmask 57344  }
  0x4b   : > { %v376_v7 = vld [vmem:[%s323_s16] sm:$0xff]  ;;  %v1033_v8 = vld [vmem:[%s1636_s2] ss:$0 sm:$0xff]  ;;  %476 = vmatpush.msra.mxu1 %v456_v20  ;;  %s1274_s16 = smov 124  }
  0x4c   : > { %402 = vmatpush.msra.mxu0 %v379_v4  ;;  %v455_v21 = vld [vmem:[#allocation8 + $0x10] sm:$0xff]  ;;  %v454_v24 = vld [vmem:[#allocation8 + $0x8] sm:$0xff] }
  0x4d   : > { %477 = vmatpush.msra.mxu1 %v455_v21  ;;  %v1034_v54 = vld [vmem:[%s1638_s4] ss:$0 sm:$0xff]  ;;  %v531_v4 = vld [vmem:[%s1639_s5 + $0x18] sm:$0xff] }
  0x4e   : > { %403 = vmatpush.msra.mxu0 %v378_v5  ;;  %v530_v5 = vld [vmem:[%s1639_s5 + $0x10] sm:$0xff]  ;;  %547 = vmatpush.msra.mxu2 %v531_v4 }
  0x4f   : > { %478 = vmatpush.msra.mxu1 %v454_v24 }
  0x50   : > { %404 = vmatpush.msra.mxu0 %v377_v6  ;;  %548 = vmatpush.msra.mxu2 %v530_v5 }
  0x51   : > { %883 = vmatmul.msk.f32.vlgmr.msra.gmra.mxu0 %vm385_vm0, %v376_v7  ;;  %479 = vmatpush.msra.mxu1 %v453_v26 }
  0xce   : > { %v406_v9 = vpop.f32.mrf.mxu0 }
  0xcf   : > { %v407_v10 = vadd.f32 %v1033_v8, %v406_v9  ;;  %v529_v8 = vld [vmem:[%s1639_s5 + $0x8] sm:$0xff] }
  0xd0   : > { %549 = vmatpush.msra.mxu2 %v529_v8 }
  0xd1   : > { %v410_v11 = vmul.f32 0.70710677, %v407_v10  ;;  %v409_v51 = vmul.f32 0.5, %v407_v10  ;;  %v528_v10 = vld [vmem:[%s1639_s5] sm:$0xff] }
  0xd2   : > { %550 = vmatpush.msra.mxu2 %v528_v10 }
  0xd3   : > { %v411_v12 = vmul.f32 %v410_v11, %v410_v11 }
  0xd5   : > { %v412_v13 = vmin.f32 %v411_v12, 16.0 }
  0xd7   : > { %v413_v14 = vmul.f32 2.1237322e-06, %v412_v13  ;;  %v424_v15 = vmul.f32 3.8918573e-05, %v412_v13 }
  0xd9   : > { %v414_v16 = vadd.f32 0.00028619796, %v413_v14  ;;  %v425_v17 = vadd.f32 0.001143296, %v424_v15 }
  0xdb   : > { %v415_v18 = vmul.f32 %v414_v16, %v412_v13  ;;  %v426_v19 = vmul.f32 %v425_v17, %v412_v13 }
  0xdd   : > { %v427_v22 = vadd.f32 0.014752088, %v426_v19  ;;  %v416_v23 = vadd.f32 0.0036580483, %v415_v18 }
  0xdf   : > { %v428_v25 = vmul.f32 %v427_v22, %v412_v13  ;;  %v417_v28 = vmul.f32 %v416_v23, %v412_v13 }
  0xe1   : > { %v429_v27 = vadd.f32 0.112945676, %v428_v25  ;;  %v418_v31 = vadd.f32 0.05243302, %v417_v28 }
  0xe3   : > { %v430_v29 = vmul.f32 %v429_v27, %v412_v13  ;;  %v419_v34 = vmul.f32 %v418_v31, %v412_v13 }
  0xe5   : > { %v431_v30 = vadd.f32 0.4994258, %v430_v29  ;;  %v420_v35 = vadd.f32 0.18741608, %v419_v34 }
  0xe7   : > { %v432_v32 = vmul.f32 %v431_v30, %v412_v13  ;;  %v421_v37 = vmul.f32 %v420_v35, %v412_v13 }
  0xe9   : > { %v433_v33 = vadd.f32 1.0, %v432_v32  ;;  %v422_v41 = vadd.f32 1.1283791, %v421_v37 }
  0xeb   : > { %1036 = vrcp.f32 %v433_v33  ;;  %v445_v40 = vand.u32 2147483648, %v433_v33  ;;  %v443_v43 = vand.u32 2147483647, %v433_v33  ;;  %vm439_vm2 = vweird.f32 %v433_v33 }
  0xec   : > { %v423_v46 = vmul.f32 %v422_v41, %v410_v11  ;;  %v1277_v41 = vmov 1  }
  0xed   : > { %v446_v45 = vor.u32 1.1754944e-38, %v445_v40  ;;  %vm444_vm4 = vcmp.eq.f32.partialorder %v443_v43, 8.507059e+37  ;;  %v1276_v40 = vmov 0   ;;  %1032 = vset.pattern.permute.xlu0 %v1277_v41 }
  0xee   : > { %1030 = vset.pattern.permute.xlu1 %v1276_v40 }
  0xf1   : > { %v1037_v36 = vpop.eup %1036 }
  0xf2   : > { %v435_v38 = vmul.f32 %v1037_v36, %v433_v33  ;;  %vm440_vm1 = vweird.f32 %v1037_v36 }
  0xf3   : > { %vm441_vm3 = vmor %vm439_vm2, %vm440_vm1 }
  0xf4   : > { %v436_v39 = vsub.f32 1.0, %v435_v38  ;;  %v1273_v38 = vmov 0.0  }
  0xf5   : > { %558 = vst.msk [vmem:[#allocation4] sm:$0x3] %vm557_vm9, %v1273_v38 }
  0xf6   : > { %v437_v42 = vmul.f32 %v1037_v36, %v436_v39  ;;  %565 = vst.msk [vmem:[#allocation4 + $0x10] sm:$0x3] %vm557_vm9, %v1273_v38 }
  0xf8   : > { %v438_v44 = vadd.f32 %v1037_v36, %v437_v42 }
  0xfa   : > { %v442_v47 = vsel %vm441_vm3, %v1037_v36, %v438_v44 }
  0xfb   : > { %v447_v48 = vsel %vm444_vm4, %v446_v45, %v442_v47  ;;  %v1035_v47 = vld [vmem:[%s1683_s26] ss:$0 sm:$0xff] }
  0xfc   : > { %v448_v49 = vmul.f32 %v447_v48, %v423_v46 }
  0xfe   : > { %v884_v50 = vclamps-f32 %v448_v49, 1.0 }
 0x100   : > { %v451_v52 = vadd.f32 1.0, %v884_v50 }
 0x102   : > { %v452_v53 = vmul.f32 %v451_v52, %v409_v51 }
 0x104   : > { %885 = vmatmul.msk.f32.vlgmr.msra.gmra.mxu1 %vm385_vm0, %v452_v53  ;;  %v888_v53 = vsel %vm582_vm12, 1.0, %v1273_v38 }
 0x181   : > { %v481_v55 = vpop.f32.mrf.mxu1 }
 0x182   : > { %v482_v56 = vadd.f32 %v1034_v54, %v481_v55 }
 0x184   : > { %v485_v57 = vmul.f32 0.70710677, %v482_v56  ;;  %v484_v35 = vmul.f32 0.5, %v482_v56 }
 0x186   : > { %v486_v58 = vmul.f32 %v485_v57, %v485_v57 }
 0x188   : > { %v487_v59 = vmin.f32 %v486_v58, 16.0 }
 0x18a   : > { %v488_v60 = vmul.f32 2.1237322e-06, %v487_v59  ;;  %v499_v61 = vmul.f32 3.8918573e-05, %v487_v59 }
 0x18c   : > { %v489_v62 = vadd.f32 0.00028619796, %v488_v60  ;;  %v500_v63 = vadd.f32 0.001143296, %v499_v61 }
 0x18e   : > { %v490_v0 = vmul.f32 %v489_v62, %v487_v59  ;;  %v501_v3 = vmul.f32 %v500_v63, %v487_v59 }
 0x190   : > { %v502_v6 = vadd.f32 0.014752088, %v501_v3  ;;  %v491_v7 = vadd.f32 0.0036580483, %v490_v0 }
 0x192   : > { %v503_v9 = vmul.f32 %v502_v6, %v487_v59  ;;  %v492_v12 = vmul.f32 %v491_v7, %v487_v59 }
 0x194   : > { %v504_v11 = vadd.f32 0.112945676, %v503_v9  ;;  %v493_v15 = vadd.f32 0.05243302, %v492_v12 }
 0x196   : > { %v505_v13 = vmul.f32 %v504_v11, %v487_v59  ;;  %v494_v18 = vmul.f32 %v493_v15, %v487_v59 }
 0x198   : > { %v506_v14 = vadd.f32 0.4994258, %v505_v13  ;;  %v495_v19 = vadd.f32 0.18741608, %v494_v18 }
 0x19a   : > { %v507_v16 = vmul.f32 %v506_v14, %v487_v59  ;;  %v496_v21 = vmul.f32 %v495_v19, %v487_v59 }
 0x19c   : > { %v508_v17 = vadd.f32 1.0, %v507_v16  ;;  %v497_v25 = vadd.f32 1.1283791, %v496_v21 }
 0x19e   : > { %1038 = vrcp.f32 %v508_v17  ;;  %v520_v24 = vand.u32 2147483648, %v508_v17  ;;  %v518_v27 = vand.u32 2147483647, %v508_v17  ;;  %vm514_vm6 = vweird.f32 %v508_v17 }
 0x19f   : > { %v498_v30 = vmul.f32 %v497_v25, %v485_v57 }
 0x1a0   : > { %v521_v29 = vor.u32 1.1754944e-38, %v520_v24  ;;  %vm519_vm8 = vcmp.eq.f32.partialorder %v518_v27, 8.507059e+37 }
 0x1a4   : > { %v1039_v20 = vpop.eup %1038 }
 0x1a5   : > { %v510_v22 = vmul.f32 %v1039_v20, %v508_v17  ;;  %vm515_vm5 = vweird.f32 %v1039_v20 }
 0x1a6   : > { %vm516_vm7 = vmor %vm514_vm6, %vm515_vm5 }
 0x1a7   : > { %v511_v23 = vsub.f32 1.0, %v510_v22 }
 0x1a9   : > { %v512_v26 = vmul.f32 %v1039_v20, %v511_v23 }
 0x1ab   : > { %v513_v28 = vadd.f32 %v1039_v20, %v512_v26 }
 0x1ad   : > { %v517_v31 = vsel %vm516_vm7, %v1039_v20, %v513_v28 }
 0x1ae   : > { %v522_v32 = vsel %vm519_vm8, %v521_v29, %v517_v31 }
 0x1af   : > { %v523_v33 = vmul.f32 %v522_v32, %v498_v30 }
 0x1b1   : > { %v886_v34 = vclamps-f32 %v523_v33, 1.0 }
 0x1b3   : > { %v526_v36 = vadd.f32 1.0, %v886_v34 }
 0x1b5   : > { %v527_v37 = vmul.f32 %v526_v36, %v484_v35 }
 0x1b7   : > { %887 = vmatmul.msk.f32.vlgmr.msra.gmra.mxu2 %vm385_vm0, %v527_v37 }
 0x23a   : > { %v552_v39 = vpop.f32.mrf.mxu2 }
 0x23b   : > { %556 = vst.msk [vmem:[#allocation4 + $0x2] sm:$0xff] %vm555_vm10, %v552_v39  ;;  %566 = vrot.lane.b32.xlu0 %v552_v39, %s1274_s16 }
 0x242   : > { %v572_v45 = vld [vmem:[#allocation4] sm:$0xff] }
 0x243   : > { %560 = vrot.lane.b32.xlu0 %v552_v39, %s1275_s18 }
 0x2ad   : > { %v567_v42 = vpop.permute.xlu0 %566 }
 0x2ae   : > { %570 = vst.msk [vmem:[#allocation4 + $0x22] sm:$0xff] %vm555_vm10, %v567_v42 }
 0x2b5   : > { %v561_v43 = vpop.permute.xlu0 %560  ;;  %v571_v44 = vld [vmem:[#allocation4 + $0x22] sm:$0xff] }
 0x2b6   : > { %564 = vst.msk [vmem:[#allocation4 + $0x12] sm:$0xff] %vm555_vm10, %v561_v43  ;;  %v573_v46 = vadd.f32 %v572_v45, %v571_v44 }
 0x2bd   : > { %v574_v48 = vld [vmem:[#allocation4 + $0x11] sm:$0xff] }
 0x2be   : > { %v575_v49 = vadd.f32 %v574_v48, %v573_v46 }
 0x2c0   : > { %v580_v50 = vadd.f32 %v1035_v47, %v575_v49 }
 0x2c2   : > { %1040 = vtanh.f32 %v580_v50 }
 0x2c8   : > { %v1041_v51 = vpop.eup %1040 }
 0x2c9   : > { %616 = vrot.lane.b32.xlu2 %v1041_v51, %s1278_s24  ;;  %587 = vperm.xlu1 %1030, %v1041_v51   ;;  %600 = vst.msk [vmem:[#allocation2] sm:$0xff] %vm599_vm11, %v1041_v51 }
 0x2d1   : > { %1031 = vset.pattern.permute.xlu1 %v1277_v41 }
 0x2d2   : > { %605 = vperm.xlu1 %1031, %v1041_v51  }
 0x323   : > { %v617_v52 = vpop.permute.xlu2 %616 }
 0x324   : > { %620 = vst.msk [vmem:[#allocation2 + $0x8] sm:$0xff] %vm599_vm11, %v617_v52 }
 0x33b   : > { %v588_v54 = vpop.permute.xlu1 %587 }
 0x33c   : > { %v590_v55 = vmul.f32 %v888_v53, %v588_v54 }
 0x33e   : > { %v592_v56 = vsel %vm591_vm13, %v590_v55, 0.0 }
 0x33f   : > { %v593_v57 = vrot.slane %v592_v56, 4 }
 0x341   : > { %v594_v58 = vadd.f32 %v593_v57, %v592_v56 }
 0x343   : > { %v595_v59 = vrot.slane %v594_v58, 2 }
 0x344   : > { %v606_v60 = vpop.permute.xlu1 %605 }
 0x345   : > { %v596_v61 = vadd.f32 %v595_v59, %v594_v58  ;;  %v608_v62 = vmul.f32 %v888_v53, %v606_v60 }
 0x347   : > { %v597_v63 = vrot.slane %v596_v61, 1  ;;  %v609_v0 = vsel %vm591_vm13, %v608_v62, 0.0 }
 0x348   : > { %v610_v3 = vrot.slane %v609_v0, 4 }
 0x349   : > { %v598_v4 = vadd.f32 %v597_v63, %v596_v61 }
 0x34a   : > { %v611_v5 = vadd.f32 %v610_v3, %v609_v0 }
 0x34b   : > { %602 = vst.msk [vmem:[#allocation3] sm:$0x1] %vm601_vm14, %v598_v4 }
 0x34c   : > { %v612_v6 = vrot.slane %v611_v5, 2 }
 0x34e   : > { %v613_v7 = vadd.f32 %v612_v6, %v611_v5 }
 0x350   : > { %v614_v8 = vrot.slane %v613_v7, 1 }
 0x352   : > { %v615_v9 = vadd.f32 %v614_v8, %v613_v7 }
 0x354   : > { %622 = vst.msk [vmem:[#allocation3 + $0x1] sm:$0x1] %vm601_vm14, %v615_v9  ;;  %v623_v10 = vadd.f32 %v615_v9, %v598_v4 }
 0x356   : > { %v624_v11 = vmul.f32 0.5, %v623_v10 }
 0x358   : > { %625 = vst.msk [vmem:[%s365_s21] sm:$0x1] %vm601_vm14, %v624_v11 }
 0x359 PF: > { %s889_s25 = sshll.u32 %s1252_s11, 3  ;;  %v1279_v12 = vmov 0   ;;  %s629_s20 = scalar_lea.vmem [#allocation3], %s1252_s11  ;;  %vm651_vm15 = vcmp.ge.s32.totalorder %v1496_v1, %v1498_v2  ;;  %vm654_vm0 = vcmp.le.s32.totalorder %v1496_v1, %v1498_v2  ;;  %v1280_v14 = vmov 1.0  }
 0x35a   : > { %1042 = vset.pattern.permute.xlu0 %v1279_v12  ;;  %s627_s22 = scalar_lea.vmem [#allocation2], %s889_s25  ;;  %893 = vmatpush.msk.msra.mxu0 %vm651_vm15, %v1280_v14  ;;  %s1684_s17 = sld [smem:[#allocation18_spill]]  ;;  %vm647_vm1 = vcmp.lt.s32.totalorder %v1498_v2, %v1496_v1  ;;  %vm649_vm2 = vcmp.gt.s32.totalorder %v1498_v2, %v1496_v1  ;;  %vm657_vm3 = vcmask 64512  }
 0x35b   : > { %v628_v13 = vld [vmem:[%s627_s22] sm:$0xff]  ;;  %895 = vmatpush.msk.msra.mxu1 %vm654_vm0, %v1280_v14  ;;  %s1685_s23 = sld [smem:[#allocation30_spill]]  ;;  %s742_s26 = sshll.u32 %s365_s21, 4  ;;  %s743_s26 = int_to_ptr.vmem [resolvable:$true] %s742_s26 }
 0x35c   : > { %633 = vperm.xlu0 %1042, %v628_v13   ;;  %v1043_v15 = vld [vmem:[%s629_s20] ss:$0 sm:$0xff]  ;;  %s716_s25 = scalar_lea.sflag [#allocation12], %s1479_s14 }
 0x361   : > { %s740_s13 = scalar_lea.hbm %s1685_s23, %s1684_s17  ;;  %s1130_s0 = scalar_lea.hbm %s1685_s23, 2 }
 0x362   : > { %s744_s24 = sshll.u32 %s740_s13, 4  ;;  %s745_s24 = int_to_ptr.hbm [resolvable:$true] %s744_s24 }
 0x363   : > { %s1124_s20 = sshra.s32 %s745_s24, 4  ;;  %s1125_s20 = int_to_ptr.hbm [resolvable:$true] %s1124_s20 }
 0x364   : > { %s1126_s22 = scalar_lea.hbm %s1125_s20, 1  ;;  %p1131_p6 = scmp.lt.s32.totalorder %s1125_s20, %s1685_s23 }
 0x365   : > { %p1127_p8 = scmp.ne.s32.totalorder %s1125_s20, %s1126_s22  ;;  %p1132_p13 = scmp.lt.s32.totalorder %s1130_s0, %s1126_s22 }
 0x367   : > { %p1128_p11 = pnand %p1127_p8, %p1454_p9  ;;  %p1133_p12 = por %p1132_p13, %p1131_p6 }
 0x369   : > { %p1129_p5 = pneg %p1128_p11 }
 0x36b   : > { %p1134_p2 = pnand %p1133_p12, %p1129_p5 }
 0x3ce   : > { %v634_v16 = vpop.permute.xlu0 %633 }
 0x3cf   : > { %v639_v17 = vsub.f32 %v634_v16, %v1043_v15 }
 0x3d1   : > { %v890_v18 = vclamps-f32 %v639_v17, 1.0 }
 0x3d3   : > { %v642_v19 = vadd.f32 1.0, %v890_v18 }
 0x3d5   : > { %v643_v20 = vmul.f32 0.5, %v642_v19 }
 0x3d7   : > { %1044 = vlog2.f32 %v643_v20 }
 0x3dd   : > { %v1045_v21 = vpop.eup %1044 }
 0x3de   : > { %v645_v22 = vmul.f32 0.6931472, %v1045_v21 }
 0x3e0   : > { %v646_v23 = vmax.f32 %v645_v22, -1e+30 }
 0x3e2   : > { %v648_v24 = vsel %vm647_vm1, %v646_v23, 0.0  ;;  %v650_v25 = vsel %vm649_vm2, %v646_v23, 0.0 }
 0x3e3   : > { %894 = vmatmul.msk.f32.vlgmr.msra.gmra.mxu0 %vm657_vm3, %v648_v24  ;;  %896 = vmatmul.msk.f32.vlgmr.msra.gmra.mxu1 %vm657_vm3, %v650_v25 }
 0x3e4   : > { %1137 = shalt.err (!%p1134_p2)
}
 0x3e5   : > { %909 = dma.vmem_to_hbm [thread:$0]  (%p1454_p9), %s743_s26, 16, %s745_s24, %s716_s25  }
 0x3e6   : > { %s898_s14 = sshll.u32 %s1684_s17, 1  ;;  %s1686_s10 = sld [smem:[#allocation29_spill]] }
 0x3e7   : > { %s723_s21 = sadd.s32 %s1252_s11, %s898_s14  ;;  %s1688_s13 = scalar_lea.vmem [#allocation10], %s1494_s8 }
 0x3e8   : > { %s899_s1 = sshll.u32 %s723_s21, 3  ;;  %s729_s20 = sshll.u32 %s1688_s13, 4  ;;  %s730_s20 = int_to_ptr.vmem [resolvable:$true] %s729_s20 }
 0x3e9   : > { %s1689_s11 = smov %s1688_s13  ;;  %s1690_s17 = sand.u32 1, %s1232_s28  }
 0x3ea   : > { %s711_s26 = scalar_lea.sflag [#allocation7], %s1690_s17 }
 0x3ec   : > { %s1687_s18 = smov %s1686_s10  ;;  %s727_s3 = scalar_lea.hbm %s1686_s10, %s899_s1 }
 0x3ed   : > { %s731_s22 = sshll.u32 %s727_s3, 4  ;;  %s1158_s21 = scalar_lea.hbm %s1687_s18, 32  ;;  %s732_s22 = int_to_ptr.hbm [resolvable:$true] %s731_s22 }
 0x3ee   : > { %s1152_s24 = sshra.s32 %s732_s22, 4  ;;  %s1153_s24 = int_to_ptr.hbm [resolvable:$true] %s1152_s24 }
 0x3ef   : > { %s1154_s25 = scalar_lea.hbm %s1153_s24, 8  ;;  %p1159_p3 = scmp.lt.s32.totalorder %s1153_s24, %s1687_s18 }
 0x3f0   : > { %p1155_p9 = scmp.ne.s32.totalorder %s1153_s24, %s1154_s25  ;;  %p1160_p8 = scmp.lt.s32.totalorder %s1158_s21, %s1154_s25 }
 0x3f2   : > { %p1156_p0 = pnand %p1155_p9, %p1438_p4  ;;  %p1161_p11 = por %p1160_p8, %p1159_p3 }
 0x3f4   : > { %p1157_p7 = pneg %p1156_p0 }
 0x3f6   : > { %p1162_p5 = pnand %p1161_p11, %p1157_p7 }
 0x460   : > { %v678_v1 = vpop.f32.mrf.mxu0  ;;  %v703_v2 = vpop.f32.mrf.mxu1 }
 0x461   : > { %v681_v26 = vmul.f32 1.442695, %v678_v1  ;;  %v706_v27 = vmul.f32 1.442695, %v703_v2 }
 0x463   : > { %1046 = vpow2.f32 %v681_v26 }
 0x464   : > { %1048 = vpow2.f32 %v706_v27 }
 0x469   : > { %v1047_v28 = vpop.eup %1046 }
 0x46a   : > { %v1049_v29 = vpop.eup %1048 }
 0x46b   : > { %v708_v30 = vmul.f32 %v1049_v29, %v1047_v28 }
 0x46d   : > { %709 = vst.msk [vmem:[%s1689_s11] sm:$0xff] %vm657_vm3, %v708_v30 }
 0x46e   : > { %1165 = shalt.err (!%p1162_p5)
}
 0x46f   : > { %908 = dma.vmem_to_hbm [thread:$0]  (%p1438_p4), %s730_s20, 128, %s732_s22, %s711_s26  }
 0x470 PF: > { %p930_p6 = scmp.ge.s32.totalorder %s1268_s15, 2  ;;  %s756_s8 = sand.u32 1, %s1228_s27  }
 0x471   : > { %s757_s6 = scalar_lea.sflag [#allocation7], %s756_s8 }
 0x472   : > { %p921_p13 = pnand %p930_p6, %p1447_p10 }
 0x474   : > { %p922_p12 = pneg %p921_p13 }
 0x476   : > { %1219 = dma.done.wait (%p922_p12), %s757_s6, 128  }
 0x477   : > { %1221 = vsyncadd (%p922_p12), %s757_s6, 4294967168  ;;  %s766_s10 = sand.u32 1, %s1240_s30   ;;  %p924_p2 = pnand %p930_p6, %p1466_p1 }
 0x478   : > { %s767_s12 = scalar_lea.sflag [#allocation12], %s766_s10 }
 0x479   : > { %p925_p9 = pneg %p924_p2 }
 0x47b   : > { %1223 = dma.done.wait (%p925_p9), %s767_s12, 16  }
 0x47c   : > { %1225 = vsyncadd (%p925_p9), %s767_s12, 4294967280  ;;  %s29_s15 = sadd.s32 1, %s1268_s15   ;;  %s1691_s19 = sld [smem:[#allocation24_spill]] }
 0x47d   : > { %p26_p4 = scmp.ge.s32.totalorder %s29_s15, 6   ;;  %s1692_s3 = sld [smem:[#allocation17_spill]] }
 0x47e   : > { %s1693_s10 = sld [smem:[#allocation23_spill]]  ;;  %s1698_s27 = smov %s1232_s28 }
 0x47f   : > { %s1694_s11 = sld [smem:[#allocation19_spill]]  ;;  %s1699_s28 = smov %s1236_s29 }
 0x480   : > { %s1695_s12 = sld [smem:[#allocation20_spill]]  ;;  %s1701_s30 = smov %s1244_s9 }
 0x481   : > { %s1696_s13 = sld [smem:[#allocation21_spill]]  ;;  %28 = sbr.rel (!%p26_p4) target bundleno = 19 (0x13), region = 124 }
 0x482   : > { %s1697_s14 = sld [smem:[#allocation22_spill]]  ;;  %s1700_s29 = smov %s1691_s19 }
 0x483   : > { %s1702_s9 = smov %s1692_s3 }
 0x486   :  { %772 = vsyncpa [#allocation6], 1 }
 0x487   :  { %774 = vsyncpa [#allocation6 + $0x1], 1 }
 0x488   :  { %775 = vsyncpa [#allocation9], 1 }
 0x489   :  { %776 = vsyncpa [#allocation7], 1 }
 0x48a   :  { %778 = vsyncpa [#allocation7 + $0x1], 1 }
 0x48b   :  { %779 = vsyncpa [#allocation12], 1 }
 0x48c   :  { %781 = vsyncpa [#allocation12 + $0x1], 1 }

</bundles_post_ra>
